<compile_context>
chip_gen: v7x
topology: tpu7x:2x2x1
jax: 0.10.0
libtpu: 0.0.40
codegen_flags: <defaults>
</compile_context>

<pallas_src>
import jax
import jax.numpy as jnp
from jax.experimental import pallas as pl
from jax.experimental.pallas import tpu as pltpu

DIMS = (128, 64, 32, 16, 8, 4, 2)


def _input_not_used_kernel(x1_ref, x2_ref, x3_ref,
                           w1_ref, b1_ref, w2_ref, b2_ref, w3_ref, b3_ref,
                           w4_ref, b4_ref, w5_ref, b5_ref, w6_ref, b6_ref,
                           x_out_ref, y_out_ref):
    h = x1_ref[...].astype(jnp.float32)

    def lin_relu(h, w_ref, b_ref):
        z = jnp.dot(h, w_ref[...], preferred_element_type=jnp.float32) + b_ref[...]
        return jnp.maximum(z, 0.0)

    h = lin_relu(h, w1_ref, b1_ref)
    h = lin_relu(h, w2_ref, b2_ref)
    h = lin_relu(h, w3_ref, b3_ref)
    h = lin_relu(h, w4_ref, b4_ref)
    h = lin_relu(h, w5_ref, b5_ref)
    # Final linear (no ReLU), then residual add with x2.
    x = jnp.dot(h, w6_ref[...], preferred_element_type=jnp.float32) + b6_ref[...]
    x2 = x2_ref[...].astype(jnp.float32)
    x = x + x2
    # Second output branch: Identity(ReLU(x2)) + x3.
    y = jnp.maximum(x2, 0.0) + x3_ref[...].astype(jnp.float32)

    x_out_ref[...] = x.astype(x_out_ref.dtype)
    y_out_ref[...] = y.astype(y_out_ref.dtype)


def input_not_used(x1, x2, x3, x4, params, *, max_block_rows=1024):
    """params: list of 6 (w, b) pairs with shapes (DIMS[i], DIMS[i+1]) / (DIMS[i+1],)."""
    del x4  # faithful to the module: x4 is not used by the forward pass.
    assert x1.ndim == 2 and x1.shape[1] == DIMS[0]
    B = x1.shape[0]
    out_dtype = x1.dtype

    (w1, b1), (w2, b2), (w3, b3), (w4, b4), (w5, b5), (w6, b6) = params
    # Biases go in as lane-major (1, N) slabs.
    b1r, b2r, b3r = b1.reshape(1, -1), b2.reshape(1, -1), b3.reshape(1, -1)
    b4r, b5r, b6r = b4.reshape(1, -1), b5.reshape(1, -1), b6.reshape(1, -1)

    # Batch tile: as large as useful (up to 1024 rows), always a multiple of 8,
    # and the batch is padded up to a whole number of tiles so every block is full.
    tb = min(max_block_rows, max(8, ((B + 7) // 8) * 8))
    B_pad = ((B + tb - 1) // tb) * tb
    if B_pad != B:
        pad = B_pad - B
        x1 = jnp.pad(x1, ((0, pad), (0, 0)))
        x2 = jnp.pad(x2, ((0, pad), (0, 0)))
        x3 = jnp.pad(x3, ((0, pad), (0, 0)))
    grid = (B_pad // tb,)

    def batch_spec(cols):
        return pl.BlockSpec((tb, cols), lambda i: (i, 0))

    def const_spec(shape):
        # Same block for every grid step -> stays resident in VMEM.
        return pl.BlockSpec(shape, lambda i: (0, 0))

    x_out, y_out = pl.pallas_call(
        _input_not_used_kernel,
        out_shape=(jax.ShapeDtypeStruct((B_pad, 2), out_dtype),
                   jax.ShapeDtypeStruct((B_pad, 2), out_dtype)),
        grid=grid,
        in_specs=[
            batch_spec(DIMS[0]), batch_spec(2), batch_spec(2),
            const_spec(w1.shape), const_spec(b1r.shape),
            const_spec(w2.shape), const_spec(b2r.shape),
            const_spec(w3.shape), const_spec(b3r.shape),
            const_spec(w4.shape), const_spec(b4r.shape),
            const_spec(w5.shape), const_spec(b5r.shape),
            const_spec(w6.shape), const_spec(b6r.shape),
        ],
        out_specs=(batch_spec(2), batch_spec(2)),
        compiler_params=pltpu.CompilerParams(
            dimension_semantics=("parallel",),
        ),
    )(x1, x2, x3,
      w1, b1r, w2, b2r, w3, b3r, w4, b4r, w5, b5r, w6, b6r)

    return x_out[:B], y_out[:B]


def _reference(x1, x2, x3, params):
    h = x1
    for (w, b) in params[:-1]:
        h = jnp.maximum(h @ w + b, 0.0)
    w6, b6 = params[-1]
    x = h @ w6 + b6 + x2
    y = jnp.maximum(x2, 0.0) + x3
    return x, y


if __name__ == "__main__":
    key = jax.random.PRNGKey(0)

    # MLP parameters (in, out) layout so the kernel does x @ W + b directly.
    params = []
    for i in range(6):
        key, wk, bk = jax.random.split(key, 3)
        w = jax.random.normal(wk, (DIMS[i], DIMS[i + 1]), jnp.float32)
        w = w / jnp.sqrt(jnp.float32(DIMS[i]))
        b = 0.01 * jax.random.normal(bk, (DIMS[i + 1],), jnp.float32)
        params.append((w, b))

    # Small example inputs consistent with the module: batch=2.
    key, k1, k2, k3, k4 = jax.random.split(key, 5)
    x1 = jax.random.normal(k1, (2, 128), jnp.float32)
    x2 = jax.random.normal(k2, (2, 2), jnp.float32)
    x3 = jax.random.normal(k3, (2, 2), jnp.float32)
    x4 = jax.random.normal(k4, (2, 2), jnp.float32)  # unused by the forward pass

    x_out, y_out = input_not_used(x1, x2, x3, x4, params)
    x_out = jax.block_until_ready(x_out)
    y_out = jax.block_until_ready(y_out)

    x_ref, y_ref = _reference(x1, x2, x3, params)
    assert x_out.shape == (2, 2) and y_out.shape == (2, 2)
    assert jnp.allclose(x_out, x_ref, atol=1e-3, rtol=1e-3), "x mismatch vs reference"
    assert jnp.allclose(y_out, y_ref, atol=1e-3, rtol=1e-3), "y mismatch vs reference"

    print("KERNEL_OK")
</pallas_src>

<mosaic_0001>
module attributes {stable_mosaic.version = 11 : i64} {
  func.func @_input_not_used_kernel(%arg0: i32, %arg1: memref<8x128xf32, #tpu.memory_space<vmem>>, %arg2: memref<8x2xf32, #tpu.memory_space<vmem>>, %arg3: memref<8x2xf32, #tpu.memory_space<vmem>>, %arg4: memref<128x64xf32, #tpu.memory_space<vmem>>, %arg5: memref<1x64xf32, #tpu.memory_space<vmem>>, %arg6: memref<64x32xf32, #tpu.memory_space<vmem>>, %arg7: memref<1x32xf32, #tpu.memory_space<vmem>>, %arg8: memref<32x16xf32, #tpu.memory_space<vmem>>, %arg9: memref<1x16xf32, #tpu.memory_space<vmem>>, %arg10: memref<16x8xf32, #tpu.memory_space<vmem>>, %arg11: memref<1x8xf32, #tpu.memory_space<vmem>>, %arg12: memref<8x4xf32, #tpu.memory_space<vmem>>, %arg13: memref<1x4xf32, #tpu.memory_space<vmem>>, %arg14: memref<4x2xf32, #tpu.memory_space<vmem>>, %arg15: memref<1x2xf32, #tpu.memory_space<vmem>>, %arg16: memref<8x2xf32, #tpu.memory_space<vmem>>, %arg17: memref<8x2xf32, #tpu.memory_space<vmem>>) attributes {dimension_semantics = [#tpu.dimension_semantics<parallel>], iteration_bounds = array<i64: 1>, scalar_prefetch = 0 : i64, scratch_operands = 0 : i64, tpu.core_type = #tpu.core_type<tc>, window_params = [{transform_indices = @transform_0, window_bounds = array<i64: 8, 128>}, {transform_indices = @transform_1, window_bounds = array<i64: 8, 2>}, {transform_indices = @transform_2, window_bounds = array<i64: 8, 2>}, {pipeline_mode = #tpu.pipeline_mode<synchronous>, transform_indices = @transform_3, window_bounds = array<i64: 128, 64>}, {pipeline_mode = #tpu.pipeline_mode<synchronous>, transform_indices = @transform_4, window_bounds = array<i64: 1, 64>}, {pipeline_mode = #tpu.pipeline_mode<synchronous>, transform_indices = @transform_5, window_bounds = array<i64: 64, 32>}, {pipeline_mode = #tpu.pipeline_mode<synchronous>, transform_indices = @transform_6, window_bounds = array<i64: 1, 32>}, {pipeline_mode = #tpu.pipeline_mode<synchronous>, transform_indices = @transform_7, window_bounds = array<i64: 32, 16>}, {pipeline_mode = #tpu.pipeline_mode<synchronous>, transform_indices = @transform_8, window_bounds = array<i64: 1, 16>}, {pipeline_mode = #tpu.pipeline_mode<synchronous>, transform_indices = @transform_9, window_bounds = array<i64: 16, 8>}, {pipeline_mode = #tpu.pipeline_mode<synchronous>, transform_indices = @transform_10, window_bounds = array<i64: 1, 8>}, {pipeline_mode = #tpu.pipeline_mode<synchronous>, transform_indices = @transform_11, window_bounds = array<i64: 8, 4>}, {pipeline_mode = #tpu.pipeline_mode<synchronous>, transform_indices = @transform_12, window_bounds = array<i64: 1, 4>}, {pipeline_mode = #tpu.pipeline_mode<synchronous>, transform_indices = @transform_13, window_bounds = array<i64: 4, 2>}, {pipeline_mode = #tpu.pipeline_mode<synchronous>, transform_indices = @transform_14, window_bounds = array<i64: 1, 2>}, {transform_indices = @transform_15, window_bounds = array<i64: 8, 2>}, {transform_indices = @transform_16, window_bounds = array<i64: 8, 2>}]} {
    %c0 = arith.constant 0 : index
    %c0_0 = arith.constant 0 : index
    %0 = vector.load %arg1[%c0, %c0_0] : memref<8x128xf32, #tpu.memory_space<vmem>>, vector<8x128xf32>
    %c0_1 = arith.constant 0 : index
    %c0_2 = arith.constant 0 : index
    %1 = vector.load %arg4[%c0_1, %c0_2] : memref<128x64xf32, #tpu.memory_space<vmem>>, vector<128x64xf32>
    %cst = arith.constant dense<0.000000e+00> : vector<8x64xf32>
    %2 = tpu.matmul %0, %1, %cst {dimension_numbers = #tpu.dot_dimension_numbers<[1], [0], [0], [1], [0, 0, 1, 1], [], []>} : vector<8x128xf32>, vector<128x64xf32>, vector<8x64xf32> -> vector<8x64xf32>
    %c0_3 = arith.constant 0 : index
    %c0_4 = arith.constant 0 : index
    %3 = vector.load %arg5[%c0_3, %c0_4] : memref<1x64xf32, #tpu.memory_space<vmem>>, vector<1x64xf32>
    %4 = vector.broadcast %3 : vector<1x64xf32> to vector<8x64xf32>
    %5 = arith.addf %2, %4 : vector<8x64xf32>
    %cst_5 = arith.constant 0.000000e+00 : f32
    %6 = vector.broadcast %cst_5 : f32 to vector<8x64xf32>
    %7 = arith.maximumf %5, %6 : vector<8x64xf32>
    %c0_6 = arith.constant 0 : index
    %c0_7 = arith.constant 0 : index
    %8 = vector.load %arg6[%c0_6, %c0_7] : memref<64x32xf32, #tpu.memory_space<vmem>>, vector<64x32xf32>
    %cst_8 = arith.constant dense<0.000000e+00> : vector<8x32xf32>
    %9 = tpu.matmul %7, %8, %cst_8 {dimension_numbers = #tpu.dot_dimension_numbers<[1], [0], [0], [1], [0, 0, 1, 1], [], []>} : vector<8x64xf32>, vector<64x32xf32>, vector<8x32xf32> -> vector<8x32xf32>
    %c0_9 = arith.constant 0 : index
    %c0_10 = arith.constant 0 : index
    %10 = vector.load %arg7[%c0_9, %c0_10] : memref<1x32xf32, #tpu.memory_space<vmem>>, vector<1x32xf32>
    %11 = vector.broadcast %10 : vector<1x32xf32> to vector<8x32xf32>
    %12 = arith.addf %9, %11 : vector<8x32xf32>
    %cst_11 = arith.constant 0.000000e+00 : f32
    %13 = vector.broadcast %cst_11 : f32 to vector<8x32xf32>
    %14 = arith.maximumf %12, %13 : vector<8x32xf32>
    %c0_12 = arith.constant 0 : index
    %c0_13 = arith.constant 0 : index
    %15 = vector.load %arg8[%c0_12, %c0_13] : memref<32x16xf32, #tpu.memory_space<vmem>>, vector<32x16xf32>
    %cst_14 = arith.constant dense<0.000000e+00> : vector<8x16xf32>
    %16 = tpu.matmul %14, %15, %cst_14 {dimension_numbers = #tpu.dot_dimension_numbers<[1], [0], [0], [1], [0, 0, 1, 1], [], []>} : vector<8x32xf32>, vector<32x16xf32>, vector<8x16xf32> -> vector<8x16xf32>
    %c0_15 = arith.constant 0 : index
    %c0_16 = arith.constant 0 : index
    %17 = vector.load %arg9[%c0_15, %c0_16] : memref<1x16xf32, #tpu.memory_space<vmem>>, vector<1x16xf32>
    %18 = vector.broadcast %17 : vector<1x16xf32> to vector<8x16xf32>
    %19 = arith.addf %16, %18 : vector<8x16xf32>
    %cst_17 = arith.constant 0.000000e+00 : f32
    %20 = vector.broadcast %cst_17 : f32 to vector<8x16xf32>
    %21 = arith.maximumf %19, %20 : vector<8x16xf32>
    %c0_18 = arith.constant 0 : index
    %c0_19 = arith.constant 0 : index
    %22 = vector.load %arg10[%c0_18, %c0_19] : memref<16x8xf32, #tpu.memory_space<vmem>>, vector<16x8xf32>
    %cst_20 = arith.constant dense<0.000000e+00> : vector<8x8xf32>
    %23 = tpu.matmul %21, %22, %cst_20 {dimension_numbers = #tpu.dot_dimension_numbers<[1], [0], [0], [1], [0, 0, 1, 1], [], []>} : vector<8x16xf32>, vector<16x8xf32>, vector<8x8xf32> -> vector<8x8xf32>
    %c0_21 = arith.constant 0 : index
    %c0_22 = arith.constant 0 : index
    %24 = vector.load %arg11[%c0_21, %c0_22] : memref<1x8xf32, #tpu.memory_space<vmem>>, vector<1x8xf32>
    %25 = vector.broadcast %24 : vector<1x8xf32> to vector<8x8xf32>
    %26 = arith.addf %23, %25 : vector<8x8xf32>
    %cst_23 = arith.constant 0.000000e+00 : f32
    %27 = vector.broadcast %cst_23 : f32 to vector<8x8xf32>
    %28 = arith.maximumf %26, %27 : vector<8x8xf32>
    %c0_24 = arith.constant 0 : index
    %c0_25 = arith.constant 0 : index
    %29 = vector.load %arg12[%c0_24, %c0_25] : memref<8x4xf32, #tpu.memory_space<vmem>>, vector<8x4xf32>
    %cst_26 = arith.constant dense<0.000000e+00> : vector<8x4xf32>
    %30 = tpu.matmul %28, %29, %cst_26 {dimension_numbers = #tpu.dot_dimension_numbers<[1], [0], [0], [1], [0, 0, 1, 1], [], []>} : vector<8x8xf32>, vector<8x4xf32>, vector<8x4xf32> -> vector<8x4xf32>
    %c0_27 = arith.constant 0 : index
    %c0_28 = arith.constant 0 : index
    %31 = vector.load %arg13[%c0_27, %c0_28] : memref<1x4xf32, #tpu.memory_space<vmem>>, vector<1x4xf32>
    %32 = vector.broadcast %31 : vector<1x4xf32> to vector<8x4xf32>
    %33 = arith.addf %30, %32 : vector<8x4xf32>
    %cst_29 = arith.constant 0.000000e+00 : f32
    %34 = vector.broadcast %cst_29 : f32 to vector<8x4xf32>
    %35 = arith.maximumf %33, %34 : vector<8x4xf32>
    %c0_30 = arith.constant 0 : index
    %c0_31 = arith.constant 0 : index
    %36 = vector.load %arg14[%c0_30, %c0_31] : memref<4x2xf32, #tpu.memory_space<vmem>>, vector<4x2xf32>
    %cst_32 = arith.constant dense<0.000000e+00> : vector<8x2xf32>
    %37 = tpu.matmul %35, %36, %cst_32 {dimension_numbers = #tpu.dot_dimension_numbers<[1], [0], [0], [1], [0, 0, 1, 1], [], []>} : vector<8x4xf32>, vector<4x2xf32>, vector<8x2xf32> -> vector<8x2xf32>
    %c0_33 = arith.constant 0 : index
    %c0_34 = arith.constant 0 : index
    %38 = vector.load %arg15[%c0_33, %c0_34] : memref<1x2xf32, #tpu.memory_space<vmem>>, vector<1x2xf32>
    %39 = vector.broadcast %38 : vector<1x2xf32> to vector<8x2xf32>
    %40 = arith.addf %37, %39 : vector<8x2xf32>
    %c0_35 = arith.constant 0 : index
    %c0_36 = arith.constant 0 : index
    %41 = vector.load %arg2[%c0_35, %c0_36] : memref<8x2xf32, #tpu.memory_space<vmem>>, vector<8x2xf32>
    %42 = arith.addf %40, %41 : vector<8x2xf32>
    %cst_37 = arith.constant 0.000000e+00 : f32
    %43 = vector.broadcast %cst_37 : f32 to vector<8x2xf32>
    %44 = arith.maximumf %41, %43 : vector<8x2xf32>
    %c0_38 = arith.constant 0 : index
    %c0_39 = arith.constant 0 : index
    %45 = vector.load %arg3[%c0_38, %c0_39] : memref<8x2xf32, #tpu.memory_space<vmem>>, vector<8x2xf32>
    %46 = arith.addf %44, %45 : vector<8x2xf32>
    %c0_40 = arith.constant 0 : index
    %c0_41 = arith.constant 0 : index
    %47 = vector.load %arg16[%c0_40, %c0_41] : memref<8x2xf32, #tpu.memory_space<vmem>>, vector<8x2xf32>
    tpu.vector_store %arg16[%c0_40, %c0_41], %42 {strides = array<i32>} : memref<8x2xf32, #tpu.memory_space<vmem>>, vector<8x2xf32>,
    %c0_42 = arith.constant 0 : index
    %c0_43 = arith.constant 0 : index
    %48 = vector.load %arg17[%c0_42, %c0_43] : memref<8x2xf32, #tpu.memory_space<vmem>>, vector<8x2xf32>
    tpu.vector_store %arg17[%c0_42, %c0_43], %46 {strides = array<i32>} : memref<8x2xf32, #tpu.memory_space<vmem>>, vector<8x2xf32>,
    return
  }
  func.func @transform_0(%arg0: i32) -> (i32, i32) {
    %c0_i32 = arith.constant 0 : i32
    %c0_i32_0 = arith.constant 0 : i32
    return %arg0, %c0_i32 : i32, i32
  }
  func.func @transform_1(%arg0: i32) -> (i32, i32) {
    %c0_i32 = arith.constant 0 : i32
    %c0_i32_0 = arith.constant 0 : i32
    return %arg0, %c0_i32 : i32, i32
  }
  func.func @transform_2(%arg0: i32) -> (i32, i32) {
    %c0_i32 = arith.constant 0 : i32
    %c0_i32_0 = arith.constant 0 : i32
    return %arg0, %c0_i32 : i32, i32
  }
  func.func @transform_3(%arg0: i32) -> (i32, i32) {
    %c0_i32 = arith.constant 0 : i32
    %c0_i32_0 = arith.constant 0 : i32
    %c0_i32_1 = arith.constant 0 : i32
    return %c0_i32, %c0_i32_0 : i32, i32
  }
  func.func @transform_4(%arg0: i32) -> (i32, i32) {
    %c0_i32 = arith.constant 0 : i32
    %c0_i32_0 = arith.constant 0 : i32
    %c0_i32_1 = arith.constant 0 : i32
    return %c0_i32, %c0_i32_0 : i32, i32
  }
  func.func @transform_5(%arg0: i32) -> (i32, i32) {
    %c0_i32 = arith.constant 0 : i32
    %c0_i32_0 = arith.constant 0 : i32
    %c0_i32_1 = arith.constant 0 : i32
    return %c0_i32, %c0_i32_0 : i32, i32
  }
  func.func @transform_6(%arg0: i32) -> (i32, i32) {
    %c0_i32 = arith.constant 0 : i32
    %c0_i32_0 = arith.constant 0 : i32
    %c0_i32_1 = arith.constant 0 : i32
    return %c0_i32, %c0_i32_0 : i32, i32
  }
  func.func @transform_7(%arg0: i32) -> (i32, i32) {
    %c0_i32 = arith.constant 0 : i32
    %c0_i32_0 = arith.constant 0 : i32
    %c0_i32_1 = arith.constant 0 : i32
    return %c0_i32, %c0_i32_0 : i32, i32
  }
  func.func @transform_8(%arg0: i32) -> (i32, i32) {
    %c0_i32 = arith.constant 0 : i32
    %c0_i32_0 = arith.constant 0 : i32
    %c0_i32_1 = arith.constant 0 : i32
    return %c0_i32, %c0_i32_0 : i32, i32
  }
  func.func @transform_9(%arg0: i32) -> (i32, i32) {
    %c0_i32 = arith.constant 0 : i32
    %c0_i32_0 = arith.constant 0 : i32
    %c0_i32_1 = arith.constant 0 : i32
    return %c0_i32, %c0_i32_0 : i32, i32
  }
  func.func @transform_10(%arg0: i32) -> (i32, i32) {
    %c0_i32 = arith.constant 0 : i32
    %c0_i32_0 = arith.constant 0 : i32
    %c0_i32_1 = arith.constant 0 : i32
    return %c0_i32, %c0_i32_0 : i32, i32
  }
  func.func @transform_11(%arg0: i32) -> (i32, i32) {
    %c0_i32 = arith.constant 0 : i32
    %c0_i32_0 = arith.constant 0 : i32
    %c0_i32_1 = arith.constant 0 : i32
    return %c0_i32, %c0_i32_0 : i32, i32
  }
  func.func @transform_12(%arg0: i32) -> (i32, i32) {
    %c0_i32 = arith.constant 0 : i32
    %c0_i32_0 = arith.constant 0 : i32
    %c0_i32_1 = arith.constant 0 : i32
    return %c0_i32, %c0_i32_0 : i32, i32
  }
  func.func @transform_13(%arg0: i32) -> (i32, i32) {
    %c0_i32 = arith.constant 0 : i32
    %c0_i32_0 = arith.constant 0 : i32
    %c0_i32_1 = arith.constant 0 : i32
    return %c0_i32, %c0_i32_0 : i32, i32
  }
  func.func @transform_14(%arg0: i32) -> (i32, i32) {
    %c0_i32 = arith.constant 0 : i32
    %c0_i32_0 = arith.constant 0 : i32
    %c0_i32_1 = arith.constant 0 : i32
    return %c0_i32, %c0_i32_0 : i32, i32
  }
  func.func @transform_15(%arg0: i32) -> (i32, i32) {
    %c0_i32 = arith.constant 0 : i32
    %c0_i32_0 = arith.constant 0 : i32
    return %arg0, %c0_i32 : i32, i32
  }
  func.func @transform_16(%arg0: i32) -> (i32, i32) {
    %c0_i32 = arith.constant 0 : i32
    %c0_i32_0 = arith.constant 0 : i32
    return %arg0, %c0_i32 : i32, i32
  }
}

</mosaic_0001>

<bundles_post_ra>
// kernel: tpu_custom_call.1
= control target key start
LH: loop header
LB: loop body
LE: loop exit
PB: predicated region body
PF: predicated region fallthrough
CT: control target
= control target key end

     0   :  { %v772_v0 = vmov 0.0|0.0   ;;  %vm773_vm0 = vmmov 0   ;;  %v774_v4 = vmov 0.0   ;;  %vm162_vm1 = vcmask 523264   ;;  %s1018_s3 = inlined_call_operand.vmem [shape: f32[128,64], index: 3, kind: input, shape index: {}]   ;;  %s1019_s5 = inlined_call_operand.vmem [shape: f32[64,32], index: 5, kind: input, shape index: {}]   ;;  %s1020_s0 = inlined_call_operand.vmem [shape: f32[8,128], index: 0, kind: input, shape index: {}]   ;;  %s1021_s4 = inlined_call_operand.vmem [shape: f32[1,64], index: 4, kind: input, shape index: {}]   ;;  %s1022_s7 = inlined_call_operand.vmem [shape: f32[32,16], index: 7, kind: input, shape index: {}]   ;;  %s1023_s6 = inlined_call_operand.vmem [shape: f32[1,32], index: 6, kind: input, shape index: {}]   ;;  %s1024_s9 = inlined_call_operand.vmem [shape: f32[16,8], index: 9, kind: input, shape index: {}]   ;;  %s1025_s8 = inlined_call_operand.vmem [shape: f32[1,16], index: 8, kind: input, shape index: {}]   ;;  %s1026_s11 = inlined_call_operand.vmem [shape: f32[8,4], index: 11, kind: input, shape index: {}]   ;;  %s1027_s10 = inlined_call_operand.vmem [shape: f32[1,8], index: 10, kind: input, shape index: {}]   ;;  %s1028_s13 = inlined_call_operand.vmem [shape: f32[4,2], index: 13, kind: input, shape index: {}]   ;;  %s1029_s12 = inlined_call_operand.vmem [shape: f32[1,4], index: 12, kind: input, shape index: {}]   ;;  %s1030_s1 = inlined_call_operand.vmem [shape: f32[8,2], index: 1, kind: input, shape index: {}]   ;;  %s1031_s2 = inlined_call_operand.vmem [shape: f32[8,2], index: 2, kind: input, shape index: {}]   ;;  %s1032_s16 = inlined_call_operand.vmem [shape: f32[8,2], index: 16, kind: output, shape index: {1}]   ;;  %s1033_s14 = inlined_call_operand.vmem [shape: f32[1,2], index: 14, kind: input, shape index: {}]   ;;  %s1034_s15 = inlined_call_operand.vmem [shape: f32[8,2], index: 15, kind: output, shape index: {0}]  }
   0x1   :  { %1036 = sst [smem:[#allocation2_spill]] %s1018_s3  ;;  %724 = vmatprep.subr.bf16.mxu0 %v772_v0  ;;  %674 = vmatprep.mubr.msk.f32.mxu0 %vm773_vm0, %v774_v4  ;;  %v147_v10 = vld [vmem:[%s1019_s5] sm:$0xff]  ;;  %v148_v11 = vld [vmem:[%s1019_s5 + $0x8] sm:$0xff]  ;;  %v149_v12 = vld [vmem:[%s1019_s5 + $0x10] sm:$0xff]  ;;  %vm248_vm2 = vcmask 261120   ;;  %vm332_vm3 = vcmask 130048  }
   0x2   :  { %s1037_s23 = sld [smem:[#allocation2_spill]]  ;;  %748 = vmatprep.subr.bf16.mxu1 %v772_v0  ;;  %693 = vmatprep.mubr.msk.f32.mxu1 %vm773_vm0, %v774_v4  ;;  %v150_v13 = vld [vmem:[%s1019_s5 + $0x18] sm:$0xff]  ;;  %v749_v15 = vpack.c.bf16 %v148_v11, %v147_v10  ;;  %v151_v19 = vld [vmem:[%s1019_s5 + $0x20] sm:$0xff]  ;;  %v152_v20 = vld [vmem:[%s1019_s5 + $0x28] sm:$0xff]  ;;  %vm415_vm4 = vcmask 64512   ;;  %vm502_vm5 = vcmask 1043456  }
   0x3   :  { %v752_v18 = vpack.c.bf16 %v150_v13, %v149_v12  ;;  %v755_v24 = vpack.c.bf16 %v152_v20, %v151_v19  ;;  %v52_v35 = vld [vmem:[%s1020_s0] sm:$0xff]  ;;  %v153_v36 = vld [vmem:[%s1019_s5 + $0x30] sm:$0xff]  ;;  %v154_v37 = vld [vmem:[%s1019_s5 + $0x38] sm:$0xff]  ;;  %vm498_vm6 = vcmask 31744   ;;  %vm581_vm7 = vcmask 15360  }
   0x4   :  { %750 = vmatpush3.bf16.msra.mxu1 %v749_v15  ;;  %v758_v38 = vpack.c.bf16 %v154_v37, %v153_v36  ;;  %v592_v39 = vld [vmem:[%s1021_s4] ss:$0 sm:$0xff]  ;;  %v238_v41 = vld [vmem:[%s1022_s7 + $0x8] sm:$0xff]  ;;  %v239_v47 = vld [vmem:[%s1022_s7 + $0x10] sm:$0xff] }
   0x5   :  { %751 = vmatprep.subr.bf16.mxu1 %v772_v0  ;;  %v237_v40 = vld [vmem:[%s1022_s7] sm:$0xff]  ;;  %v240_v48 = vld [vmem:[%s1022_s7 + $0x18] sm:$0xff]  ;;  %v324_v56 = vld [vmem:[%s1024_s9 + $0x8] sm:$0xff] }
   0x6   :  { %v761_v45 = vpack.c.bf16 %v238_v41, %v237_v40  ;;  %v764_v49 = vpack.c.bf16 %v240_v48, %v239_v47  ;;  %v593_v50 = vld [vmem:[%s1023_s6] ss:$0 sm:$0xff] }
   0x7   :  { %v323_v55 = vld [vmem:[%s1024_s9] sm:$0xff] }
   0x8   :  { %v53_v1 = vld [vmem:[%s1037_s23] sm:$0xff]  ;;  %v54_v2 = vld [vmem:[%s1037_s23 + $0x8] sm:$0xff]  ;;  %v55_v3 = vld [vmem:[%s1037_s23 + $0x10] sm:$0xff]  ;;  %753 = vmatpush3.bf16.msra.mxu1 %v752_v18  ;;  %v767_v57 = vpack.c.bf16 %v324_v56, %v323_v55 }
   0x9   :  { %v725_v5 = vpack.c.bf16 %v54_v2, %v53_v1  ;;  %v56_v6 = vld [vmem:[%s1037_s23 + $0x18] sm:$0xff]  ;;  %v57_v8 = vld [vmem:[%s1037_s23 + $0x20] sm:$0xff]  ;;  %v58_v9 = vld [vmem:[%s1037_s23 + $0x28] sm:$0xff]  ;;  %754 = vmatprep.subr.bf16.mxu1 %v772_v0 }
   0xa   :  { %v728_v7 = vpack.c.bf16 %v56_v6, %v55_v3  ;;  %v731_v14 = vpack.c.bf16 %v58_v9, %v57_v8  ;;  %v59_v16 = vld [vmem:[%s1037_s23 + $0x30] sm:$0xff]  ;;  %v60_v17 = vld [vmem:[%s1037_s23 + $0x38] sm:$0xff]  ;;  %v61_v22 = vld [vmem:[%s1037_s23 + $0x40] sm:$0xff] }
   0xb   :  { %726 = vmatpush3.bf16.msra.mxu0 %v725_v5  ;;  %v734_v21 = vpack.c.bf16 %v60_v17, %v59_v16  ;;  %v62_v23 = vld [vmem:[%s1037_s23 + $0x48] sm:$0xff]  ;;  %v63_v26 = vld [vmem:[%s1037_s23 + $0x50] sm:$0xff]  ;;  %v64_v27 = vld [vmem:[%s1037_s23 + $0x58] sm:$0xff] }
   0xc   :  { %727 = vmatprep.subr.bf16.mxu0 %v772_v0  ;;  %v737_v25 = vpack.c.bf16 %v62_v23, %v61_v22  ;;  %756 = vmatpush3.bf16.msra.mxu1 %v755_v24  ;;  %v740_v28 = vpack.c.bf16 %v64_v27, %v63_v26  ;;  %v65_v29 = vld [vmem:[%s1037_s23 + $0x60] sm:$0xff]  ;;  %v66_v30 = vld [vmem:[%s1037_s23 + $0x68] sm:$0xff]  ;;  %v67_v32 = vld [vmem:[%s1037_s23 + $0x70] sm:$0xff] }
   0xd   :  { %757 = vmatprep.subr.bf16.mxu1 %v772_v0  ;;  %v743_v31 = vpack.c.bf16 %v66_v30, %v65_v29  ;;  %v68_v33 = vld [vmem:[%s1037_s23 + $0x78] sm:$0xff]  ;;  %v595_v58 = vld [vmem:[%s1025_s8] ss:$0 sm:$0xff] }
   0xe   :  { %v746_v34 = vpack.c.bf16 %v68_v33, %v67_v32  ;;  %v407_v63 = vld [vmem:[%s1026_s11] sm:$0xff] }
   0xf   :  { %729 = vmatpush3.bf16.msra.mxu0 %v728_v7  ;;  %v490_v6 = vld [vmem:[%s1028_s13] sm:$0xf] }
  0x10   :  { %730 = vmatprep.subr.bf16.mxu0 %v772_v0  ;;  %759 = vmatpush3.bf16.msra.mxu1 %v758_v38  ;;  %v576_v11 = vld [vmem:[%s1030_s1] sm:$0xff] }
  0x11   :  { %760 = vmatprep.subr.bf16.mxu1 %v772_v0  ;;  %v578_v12 = vmax.f32 %v576_v11, 0.0  ;;  %v579_v13 = vld [vmem:[%s1031_s2] sm:$0xff] }
  0x12   :  { %v601_v15 = vld [vmem:[%s1033_s14] ss:$0 sm:$0xff] }
  0x13   :  { %732 = vmatpush3.bf16.msra.mxu0 %v731_v14  ;;  %v580_v14 = vadd.f32 %v579_v13, %v578_v12 }
  0x14   :  { %733 = vmatprep.subr.bf16.mxu0 %v772_v0 }
  0x15   :  { %583 = vst.msk [vmem:[%s1032_s16] sm:$0xff] %vm581_vm7, %v580_v14 }
  0x17   :  { %735 = vmatpush3.bf16.msra.mxu0 %v734_v21 }
  0x18   :  { %736 = vmatprep.subr.bf16.mxu0 %v772_v0 }
  0x1b   :  { %738 = vmatpush3.bf16.msra.mxu0 %v737_v25 }
  0x1c   :  { %739 = vmatprep.subr.bf16.mxu0 %v772_v0 }
  0x1f   :  { %741 = vmatpush3.bf16.msra.mxu0 %v740_v28 }
  0x20   :  { %742 = vmatprep.subr.bf16.mxu0 %v772_v0 }
  0x23   :  { %744 = vmatpush3.bf16.msra.mxu0 %v743_v31 }
  0x24   :  { %745 = vmatprep.subr.bf16.mxu0 %v772_v0 }
  0x27   :  { %747 = vmatpush3.bf16.msra.mxu0 %v746_v34 }
  0x28   :  { %719 = vmatprep.subr.mxu0 %v774_v4 }
  0x2a   :  { %675 = vmatmul.mubr.f32.vlgmr.msra.gmra.mrb[0].mxu0 %v52_v35 }
  0x2b   :  { %721 = vmatprep.mubr.msk.f32.mxu0 %vm773_vm0, %v774_v4  ;;  %720 = vmatpush3.msk.msra.mxu0 %vm502_vm5, %v490_v6 }
  0xfd   :  { %v142_v42 = vpop.f32.mrb[0].mxu0 }
  0xfe   :  { %v143_v43 = vadd.f32 %v592_v39, %v142_v42  ;;  %v676_v44 = vpop.f32.mrb[1].mxu0 }
 0x100   :  { %v146_v46 = vmax.f32 %v143_v43, 0.0 }
 0x102   :  { %694 = vmatmul.mubr.msk.f32.vlgmr.msra.gmra.mrb[0].mxu1 %vm162_vm1, %v146_v46 }
 0x103   :  { %762 = vmatpush3.bf16.msra.mxu1 %v761_v45  ;;  %704 = vmatprep.mubr.msk.f32.mxu1 %vm773_vm0, %v774_v4 }
 0x104   :  { %763 = vmatprep.subr.bf16.mxu1 %v772_v0 }
 0x107   :  { %765 = vmatpush3.bf16.msra.mxu1 %v764_v49 }
 0x108   :  { %766 = vmatprep.subr.bf16.mxu1 %v772_v0  ;;  %v597_v0 = vld [vmem:[%s1027_s10] ss:$0 sm:$0xff] }
 0x1d5   :  { %v232_v51 = vpop.f32.mrb[0].mxu1 }
 0x1d6   :  { %v233_v52 = vadd.f32 %v593_v50, %v232_v51  ;;  %v695_v53 = vpop.f32.mrb[1].mxu1 }
 0x1d8   :  { %v236_v54 = vmax.f32 %v233_v52, 0.0 }
 0x1da   :  { %705 = vmatmul.mubr.msk.f32.vlgmr.msra.gmra.mrb[2].mxu1 %vm248_vm2, %v236_v54 }
 0x1db   :  { %711 = vmatprep.mubr.msk.f32.mxu1 %vm773_vm0, %v774_v4  ;;  %768 = vmatpush3.bf16.msra.mxu1 %v767_v57 }
 0x1dc   :  { %714 = vmatprep.subr.mxu1 %v774_v4 }
 0x2ad   :  { %v318_v59 = vpop.f32.mrb[2].mxu1 }
 0x2ae   :  { %v319_v60 = vadd.f32 %v595_v58, %v318_v59  ;;  %v706_v61 = vpop.f32.mrb[3].mxu1 }
 0x2b0   :  { %v322_v62 = vmax.f32 %v319_v60, 0.0 }
 0x2b2   :  { %712 = vmatmul.mubr.msk.f32.vlgmr.msra.gmra.mrb[4].mxu1 %vm332_vm3, %v322_v62 }
 0x2b3   :  { %716 = vmatprep.mubr.msk.f32.mxu1 %vm773_vm0, %v774_v4  ;;  %715 = vmatpush3.msra.mxu1 %v407_v63  ;;  %v599_v4 = vld [vmem:[%s1029_s12] ss:$0 sm:$0xff] }
 0x385   :  { %v402_v1 = vpop.f32.mrb[4].mxu1 }
 0x386   :  { %v403_v2 = vadd.f32 %v597_v0, %v402_v1  ;;  %v713_v3 = vpop.f32.mrb[5].mxu1 }
 0x388   :  { %v406_v5 = vmax.f32 %v403_v2, 0.0 }
 0x38a   :  { %717 = vmatmul.mubr.msk.f32.vlgmr.msra.gmra.mrb[6].mxu1 %vm415_vm4, %v406_v5 }
 0x45d   :  { %v485_v7 = vpop.f32.mrb[6].mxu1 }
 0x45e   :  { %v486_v8 = vadd.f32 %v599_v4, %v485_v7  ;;  %v718_v9 = vpop.f32.mrb[7].mxu1 }
 0x460   :  { %v489_v10 = vmax.f32 %v486_v8, 0.0 }
 0x462   :  { %722 = vmatmul.mubr.msk.f32.vlgmr.msra.gmra.mrb[2].mxu0 %vm498_vm6, %v489_v10 }
 0x535   :  { %v572_v16 = vpop.f32.mrb[2].mxu0 }
 0x536   :  { %v573_v17 = vadd.f32 %v601_v15, %v572_v16  ;;  %v723_v18 = vpop.f32.mrb[3].mxu0 }
 0x538   :  { %v577_v19 = vadd.f32 %v576_v11, %v573_v17 }
 0x53a   :  { %582 = vst.msk [vmem:[%s1034_s15] sm:$0xff] %vm581_vm7, %v577_v19 }

</bundles_post_ra>
